<compile_context>
chip_gen: v6e
topology: v6e:2x2x1
jax: 0.10.0
libtpu: 0.0.40
codegen_flags: <defaults>
</compile_context>

<pallas_src>
import math

import jax
import jax.numpy as jnp
import numpy as np
from jax.experimental import pallas as pl
from jax.experimental.pallas import tpu as pltpu


def _chunk3_sizes(n: int):
    """torch.chunk(., 3, dim) sizes: chunk_size = ceil(n/3), last = remainder.

    NOTE: torch.chunk returns *fewer* than 3 chunks when the remainder would
    be empty (e.g. n=4 -> [2, 2]); aten_chunk_3 unpacks exactly 3 outputs, so
    we require the third chunk to be non-empty and assert otherwise.
    """
    chunk = -(-n // 3)  # ceil(n / 3)
    s2 = n - 2 * chunk
    assert s2 > 0, "dim too small to produce 3 non-empty chunks"
    return (chunk, chunk, s2)


def _collapse(x: jax.Array, dim: int):
    """Reshape x to 2-D (prefix, n*suffix): chunk axis folded into a lane-dense
    trailing axis.  Returns (x2, suffix)."""
    shape = x.shape
    n = shape[dim]
    prefix = math.prod(shape[:dim])
    suffix = math.prod(shape[dim + 1:])
    return x.reshape(prefix, n * suffix), suffix


def _vmem_capacity_bytes() -> int:
    """Physical VMEM per core; conservative default if the query is missing."""
    try:
        return int(pltpu.get_tpu_info().vmem_capacity_bytes)
    except Exception:
        return 64 * 1024 * 1024  # v7x per-core size: safe everywhere


# ----------------------------------------------------------------------------
# DMA path: strided HBM -> HBM copies (large per-row bursts).
# ----------------------------------------------------------------------------
def _row_partitions(prefix: int, k: int):
    base, rem = divmod(prefix, k)
    parts, r = [], 0
    for i in range(k):
        n = base + (1 if i < rem else 0)
        if n > 0:
            parts.append((r, n))
            r += n
    return parts


def _make_dma_kernel(col_starts, col_sizes, row_parts):
    def kernel(x_ref, a_ref, b_ref, c_ref, sem):
        out_refs = (a_ref, b_ref, c_ref)
        copies = []
        # Issue all chunk x row-partition copies, then wait for all of them so
        # the DMA engines always have several descriptors outstanding.
        for i in range(3):
            for p, (r0, rn) in enumerate(row_parts):
                cp = pltpu.make_async_copy(
                    x_ref.at[pl.ds(r0, rn), pl.ds(col_starts[i], col_sizes[i])],
                    out_refs[i].at[pl.ds(r0, rn), pl.ds(0, col_sizes[i])],
                    sem.at[i, p],
                )
                cp.start()
                copies.append(cp)
        for cp in copies:
            cp.wait()

    return kernel


def _chunk3_dma(x2, col_starts, col_sizes):
    prefix = x2.shape[0]
    # Split strided copies into a few row partitions: more outstanding
    # descriptors hide per-descriptor setup latency; neutral once HBM is
    # already saturated.
    k = 4 if prefix >= 1024 else (2 if prefix >= 2 else 1)
    row_parts = _row_partitions(prefix, k)
    out_shapes = tuple(
        jax.ShapeDtypeStruct((prefix, cs), x2.dtype) for cs in col_sizes
    )
    # TODO(synk): on v7x (2 TensorCores / chip), shard the DMA issue across
    # cores via a parallel grid axis once a robust chip-version gate exists.
    return pl.pallas_call(
        _make_dma_kernel(col_starts, col_sizes, row_parts),
        out_shape=out_shapes,
        in_specs=[pl.BlockSpec(memory_space=pl.ANY)],
        out_specs=tuple(pl.BlockSpec(memory_space=pl.ANY) for _ in range(3)),
        scratch_shapes=[pltpu.SemaphoreType.DMA((3, len(row_parts)))],
    )(x2)


# ----------------------------------------------------------------------------
# Tiled VMEM path: lane-axis / tiny-row chunking (reads each row once).
# ----------------------------------------------------------------------------
def _make_vmem_kernel(col_starts, col_sizes):
    def kernel(x_ref, a_ref, b_ref, c_ref):
        for out_ref, st, sz in zip((a_ref, b_ref, c_ref), col_starts, col_sizes):
            out_ref[...] = x_ref[:, pl.ds(st, sz)]

    return kernel


def _chunk3_vmem(x2, col_starts, col_sizes):
    prefix, total_cols = x2.shape
    itemsize = x2.dtype.itemsize

    cap = _vmem_capacity_bytes()
    budget = (cap * 3) // 4  # ~25% headroom below physical VMEM
    # Per-tile footprint: input block + 3 output blocks (their widths sum to
    # total_cols), times 2 for BlockSpec double-buffering.
    bytes_per_row = 4 * total_cols * itemsize
    tile_rows = budget // max(bytes_per_row, 1)
    tile_rows = max(8, (tile_rows // 8) * 8)  # sublane-aligned
    if tile_rows >= prefix:
        tile_rows = prefix  # block == full array: always layout-legal
    grid = (pl.cdiv(prefix, tile_rows),)

    need = 4 * tile_rows * total_cols * itemsize + (2 << 20)
    vmem_limit = int(min(max(need, 32 << 20), cap - (2 << 20)))

    out_shapes = tuple(
        jax.ShapeDtypeStruct((prefix, cs), x2.dtype) for cs in col_sizes
    )
    # Output last dims can be sub-128 (masked vst); that's fine — the kernel is
    # mem-bound and the HBM-side DMAs stay contiguous and burst-efficient.
    return pl.pallas_call(
        _make_vmem_kernel(col_starts, col_sizes),
        out_shape=out_shapes,
        grid=grid,
        in_specs=[pl.BlockSpec((tile_rows, total_cols), lambda i: (i, 0))],
        out_specs=tuple(
            pl.BlockSpec((tile_rows, cs), lambda i: (i, 0)) for cs in col_sizes
        ),
        compiler_params=pltpu.CompilerParams(
            dimension_semantics=("parallel",),
            vmem_limit_bytes=vmem_limit,
        ),
    )(x2)


def chunk3_pallas(x: jax.Array, dim: int):
    """Equivalent of torch.chunk(x, chunks=3, dim=dim) returning a 3-tuple."""
    dim = dim % x.ndim
    sizes = _chunk3_sizes(x.shape[dim])
    starts = (0, sizes[0], sizes[0] + sizes[1])

    x2, suffix = _collapse(x, dim)
    itemsize = x2.dtype.itemsize
    col_starts = tuple(s * suffix for s in starts)
    col_sizes = tuple(s * suffix for s in sizes)

    # Static dispatch: strided HBM->HBM DMA only pays off when each per-chunk
    # row is a decent burst; tiny rows (e.g. chunking the last/lane axis) are
    # routed to the tiled VMEM copy, which reads each contiguous row once.
    min_row_bytes = min(cs * itemsize for cs in col_sizes)
    if min_row_bytes >= 512:
        outs = _chunk3_dma(x2, col_starts, col_sizes)
    else:
        outs = _chunk3_vmem(x2, col_starts, col_sizes)

    out_full_shapes = tuple(
        x.shape[:dim] + (sz,) + x.shape[dim + 1:] for sz in sizes
    )
    return tuple(o.reshape(s) for o, s in zip(outs, out_full_shapes))


if __name__ == "__main__":
    key = jax.random.PRNGKey(0)
    # Case 1: NCHW input, chunk along the channel dim (dim=1): 6 -> (2, 2, 2).
    # Per-row chunk copy = 2*16*16 f32 = 2048 B -> DMA path.
    x = jax.random.normal(key, (2, 6, 16, 16), dtype=jnp.float32)
    dim = 1

    a, b, c = chunk3_pallas(x, dim)
    jax.block_until_ready((a, b, c))

    x_np = np.asarray(x)
    s0, s1, s2 = _chunk3_sizes(x.shape[dim])
    np.testing.assert_array_equal(np.asarray(a), x_np[:, :s0])
    np.testing.assert_array_equal(np.asarray(b), x_np[:, s0:s0 + s1])
    np.testing.assert_array_equal(np.asarray(c), x_np[:, s0 + s1:])

    # Case 2: chunk along the last (lane) axis, 16 -> (6, 6, 4).  Per-row
    # chunk copy is 16-24 B -> tiled VMEM path.
    y = jax.random.normal(jax.random.PRNGKey(1), (2, 6, 16, 16), dtype=jnp.float32)
    a2, b2, c2 = chunk3_pallas(y, -1)
    jax.block_until_ready((a2, b2, c2))

    y_np = np.asarray(y)
    t0, t1, t2 = _chunk3_sizes(y.shape[-1])
    np.testing.assert_array_equal(np.asarray(a2), y_np[..., :t0])
    np.testing.assert_array_equal(np.asarray(b2), y_np[..., t0:t0 + t1])
    np.testing.assert_array_equal(np.asarray(c2), y_np[..., t0 + t1:])

    print("KERNEL_OK")
</pallas_src>

<mosaic_0001>
module attributes {stable_mosaic.version = 11 : i64} {
  func.func @kernel(%arg0: memref<2x1536xf32, #tpu.memory_space<any>>, %arg1: memref<2x512xf32, #tpu.memory_space<any>>, %arg2: memref<2x512xf32, #tpu.memory_space<any>>, %arg3: memref<2x512xf32, #tpu.memory_space<any>>, %arg4: memref<3x2x!tpu.dma_semaphore, #tpu.memory_space<semaphore_mem>>) attributes {dimension_semantics = [], scalar_prefetch = 0 : i64, scratch_operands = 1 : i64, tpu.core_type = #tpu.core_type<tc>} {
    %c0_i32 = arith.constant 0 : i32
    %c0_i32_0 = arith.constant 0 : i32
    %c0_i32_1 = arith.constant 0 : i32
    %c0_i32_2 = arith.constant 0 : i32
    %0 = tpu.memref_slice %arg0[%c0_i32_1, %c0_i32_2] : memref<2x1536xf32, #tpu.memory_space<any>> -> memref<1x512xf32, #tpu.memory_space<any>>
    %c0_i32_3 = arith.constant 0 : i32
    %c0_i32_4 = arith.constant 0 : i32
    %1 = tpu.memref_slice %arg1[%c0_i32_3, %c0_i32_4] : memref<2x512xf32, #tpu.memory_space<any>> -> memref<1x512xf32, #tpu.memory_space<any>>
    %2 = tpu.memref_slice %arg4[%c0_i32, %c0_i32_0] : memref<3x2x!tpu.dma_semaphore, #tpu.memory_space<semaphore_mem>> -> memref<1x1x!tpu.dma_semaphore, #tpu.memory_space<semaphore_mem>>
    %3 = tpu.memref_squeeze %2 : memref<1x1x!tpu.dma_semaphore, #tpu.memory_space<semaphore_mem>> -> memref<!tpu.dma_semaphore, #tpu.memory_space<semaphore_mem>>
    tpu.enqueue_dma source(%0 : memref<1x512xf32, #tpu.memory_space<any>>) target(%1 : memref<1x512xf32, #tpu.memory_space<any>>) target_semaphore(%3 : memref<!tpu.dma_semaphore, #tpu.memory_space<semaphore_mem>>)
    %c0_i32_5 = arith.constant 0 : i32
    %c1_i32 = arith.constant 1 : i32
    %c1_i32_6 = arith.constant 1 : i32
    %c0_i32_7 = arith.constant 0 : i32
    %4 = tpu.memref_slice %arg0[%c1_i32_6, %c0_i32_7] : memref<2x1536xf32, #tpu.memory_space<any>> -> memref<1x512xf32, #tpu.memory_space<any>>
    %c1_i32_8 = arith.constant 1 : i32
    %c0_i32_9 = arith.constant 0 : i32
    %5 = tpu.memref_slice %arg1[%c1_i32_8, %c0_i32_9] : memref<2x512xf32, #tpu.memory_space<any>> -> memref<1x512xf32, #tpu.memory_space<any>>
    %6 = tpu.memref_slice %arg4[%c0_i32_5, %c1_i32] : memref<3x2x!tpu.dma_semaphore, #tpu.memory_space<semaphore_mem>> -> memref<1x1x!tpu.dma_semaphore, #tpu.memory_space<semaphore_mem>>
    %7 = tpu.memref_squeeze %6 : memref<1x1x!tpu.dma_semaphore, #tpu.memory_space<semaphore_mem>> -> memref<!tpu.dma_semaphore, #tpu.memory_space<semaphore_mem>>
    tpu.enqueue_dma source(%4 : memref<1x512xf32, #tpu.memory_space<any>>) target(%5 : memref<1x512xf32, #tpu.memory_space<any>>) target_semaphore(%7 : memref<!tpu.dma_semaphore, #tpu.memory_space<semaphore_mem>>)
    %c1_i32_10 = arith.constant 1 : i32
    %c0_i32_11 = arith.constant 0 : i32
    %c0_i32_12 = arith.constant 0 : i32
    %c512_i32 = arith.constant 512 : i32
    %8 = tpu.memref_slice %arg0[%c0_i32_12, %c512_i32] : memref<2x1536xf32, #tpu.memory_space<any>> -> memref<1x512xf32, #tpu.memory_space<any>>
    %c0_i32_13 = arith.constant 0 : i32
    %c0_i32_14 = arith.constant 0 : i32
    %9 = tpu.memref_slice %arg2[%c0_i32_13, %c0_i32_14] : memref<2x512xf32, #tpu.memory_space<any>> -> memref<1x512xf32, #tpu.memory_space<any>>
    %10 = tpu.memref_slice %arg4[%c1_i32_10, %c0_i32_11] : memref<3x2x!tpu.dma_semaphore, #tpu.memory_space<semaphore_mem>> -> memref<1x1x!tpu.dma_semaphore, #tpu.memory_space<semaphore_mem>>
    %11 = tpu.memref_squeeze %10 : memref<1x1x!tpu.dma_semaphore, #tpu.memory_space<semaphore_mem>> -> memref<!tpu.dma_semaphore, #tpu.memory_space<semaphore_mem>>
    tpu.enqueue_dma source(%8 : memref<1x512xf32, #tpu.memory_space<any>>) target(%9 : memref<1x512xf32, #tpu.memory_space<any>>) target_semaphore(%11 : memref<!tpu.dma_semaphore, #tpu.memory_space<semaphore_mem>>)
    %c1_i32_15 = arith.constant 1 : i32
    %c1_i32_16 = arith.constant 1 : i32
    %c1_i32_17 = arith.constant 1 : i32
    %c512_i32_18 = arith.constant 512 : i32
    %12 = tpu.memref_slice %arg0[%c1_i32_17, %c512_i32_18] : memref<2x1536xf32, #tpu.memory_space<any>> -> memref<1x512xf32, #tpu.memory_space<any>>
    %c1_i32_19 = arith.constant 1 : i32
    %c0_i32_20 = arith.constant 0 : i32
    %13 = tpu.memref_slice %arg2[%c1_i32_19, %c0_i32_20] : memref<2x512xf32, #tpu.memory_space<any>> -> memref<1x512xf32, #tpu.memory_space<any>>
    %14 = tpu.memref_slice %arg4[%c1_i32_15, %c1_i32_16] : memref<3x2x!tpu.dma_semaphore, #tpu.memory_space<semaphore_mem>> -> memref<1x1x!tpu.dma_semaphore, #tpu.memory_space<semaphore_mem>>
    %15 = tpu.memref_squeeze %14 : memref<1x1x!tpu.dma_semaphore, #tpu.memory_space<semaphore_mem>> -> memref<!tpu.dma_semaphore, #tpu.memory_space<semaphore_mem>>
    tpu.enqueue_dma source(%12 : memref<1x512xf32, #tpu.memory_space<any>>) target(%13 : memref<1x512xf32, #tpu.memory_space<any>>) target_semaphore(%15 : memref<!tpu.dma_semaphore, #tpu.memory_space<semaphore_mem>>)
    %c2_i32 = arith.constant 2 : i32
    %c0_i32_21 = arith.constant 0 : i32
    %c0_i32_22 = arith.constant 0 : i32
    %c1024_i32 = arith.constant 1024 : i32
    %16 = tpu.memref_slice %arg0[%c0_i32_22, %c1024_i32] : memref<2x1536xf32, #tpu.memory_space<any>> -> memref<1x512xf32, #tpu.memory_space<any>>
    %c0_i32_23 = arith.constant 0 : i32
    %c0_i32_24 = arith.constant 0 : i32
    %17 = tpu.memref_slice %arg3[%c0_i32_23, %c0_i32_24] : memref<2x512xf32, #tpu.memory_space<any>> -> memref<1x512xf32, #tpu.memory_space<any>>
    %18 = tpu.memref_slice %arg4[%c2_i32, %c0_i32_21] : memref<3x2x!tpu.dma_semaphore, #tpu.memory_space<semaphore_mem>> -> memref<1x1x!tpu.dma_semaphore, #tpu.memory_space<semaphore_mem>>
    %19 = tpu.memref_squeeze %18 : memref<1x1x!tpu.dma_semaphore, #tpu.memory_space<semaphore_mem>> -> memref<!tpu.dma_semaphore, #tpu.memory_space<semaphore_mem>>
    tpu.enqueue_dma source(%16 : memref<1x512xf32, #tpu.memory_space<any>>) target(%17 : memref<1x512xf32, #tpu.memory_space<any>>) target_semaphore(%19 : memref<!tpu.dma_semaphore, #tpu.memory_space<semaphore_mem>>)
    %c2_i32_25 = arith.constant 2 : i32
    %c1_i32_26 = arith.constant 1 : i32
    %c1_i32_27 = arith.constant 1 : i32
    %c1024_i32_28 = arith.constant 1024 : i32
    %20 = tpu.memref_slice %arg0[%c1_i32_27, %c1024_i32_28] : memref<2x1536xf32, #tpu.memory_space<any>> -> memref<1x512xf32, #tpu.memory_space<any>>
    %c1_i32_29 = arith.constant 1 : i32
    %c0_i32_30 = arith.constant 0 : i32
    %21 = tpu.memref_slice %arg3[%c1_i32_29, %c0_i32_30] : memref<2x512xf32, #tpu.memory_space<any>> -> memref<1x512xf32, #tpu.memory_space<any>>
    %22 = tpu.memref_slice %arg4[%c2_i32_25, %c1_i32_26] : memref<3x2x!tpu.dma_semaphore, #tpu.memory_space<semaphore_mem>> -> memref<1x1x!tpu.dma_semaphore, #tpu.memory_space<semaphore_mem>>
    %23 = tpu.memref_squeeze %22 : memref<1x1x!tpu.dma_semaphore, #tpu.memory_space<semaphore_mem>> -> memref<!tpu.dma_semaphore, #tpu.memory_space<semaphore_mem>>
    tpu.enqueue_dma source(%20 : memref<1x512xf32, #tpu.memory_space<any>>) target(%21 : memref<1x512xf32, #tpu.memory_space<any>>) target_semaphore(%23 : memref<!tpu.dma_semaphore, #tpu.memory_space<semaphore_mem>>)
    %c0_i32_31 = arith.constant 0 : i32
    %c0_i32_32 = arith.constant 0 : i32
    %c0_i32_33 = arith.constant 0 : i32
    %c0_i32_34 = arith.constant 0 : i32
    %24 = tpu.memref_slice %arg0[%c0_i32_33, %c0_i32_34] : memref<2x1536xf32, #tpu.memory_space<any>> -> memref<1x512xf32, #tpu.memory_space<any>>
    %c0_i32_35 = arith.constant 0 : i32
    %c0_i32_36 = arith.constant 0 : i32
    %25 = tpu.memref_slice %arg1[%c0_i32_35, %c0_i32_36] : memref<2x512xf32, #tpu.memory_space<any>> -> memref<1x512xf32, #tpu.memory_space<any>>
    %26 = tpu.memref_slice %arg4[%c0_i32_31, %c0_i32_32] : memref<3x2x!tpu.dma_semaphore, #tpu.memory_space<semaphore_mem>> -> memref<1x1x!tpu.dma_semaphore, #tpu.memory_space<semaphore_mem>>
    %27 = tpu.memref_squeeze %26 : memref<1x1x!tpu.dma_semaphore, #tpu.memory_space<semaphore_mem>> -> memref<!tpu.dma_semaphore, #tpu.memory_space<semaphore_mem>>
    tpu.wait_dma2 semaphore(%27 : memref<!tpu.dma_semaphore, #tpu.memory_space<semaphore_mem>>) src(%24 : memref<1x512xf32, #tpu.memory_space<any>>) dst(%25 : memref<1x512xf32, #tpu.memory_space<any>>)
    %c0_i32_37 = arith.constant 0 : i32
    %c1_i32_38 = arith.constant 1 : i32
    %c1_i32_39 = arith.constant 1 : i32
    %c0_i32_40 = arith.constant 0 : i32
    %28 = tpu.memref_slice %arg0[%c1_i32_39, %c0_i32_40] : memref<2x1536xf32, #tpu.memory_space<any>> -> memref<1x512xf32, #tpu.memory_space<any>>
    %c1_i32_41 = arith.constant 1 : i32
    %c0_i32_42 = arith.constant 0 : i32
    %29 = tpu.memref_slice %arg1[%c1_i32_41, %c0_i32_42] : memref<2x512xf32, #tpu.memory_space<any>> -> memref<1x512xf32, #tpu.memory_space<any>>
    %30 = tpu.memref_slice %arg4[%c0_i32_37, %c1_i32_38] : memref<3x2x!tpu.dma_semaphore, #tpu.memory_space<semaphore_mem>> -> memref<1x1x!tpu.dma_semaphore, #tpu.memory_space<semaphore_mem>>
    %31 = tpu.memref_squeeze %30 : memref<1x1x!tpu.dma_semaphore, #tpu.memory_space<semaphore_mem>> -> memref<!tpu.dma_semaphore, #tpu.memory_space<semaphore_mem>>
    tpu.wait_dma2 semaphore(%31 : memref<!tpu.dma_semaphore, #tpu.memory_space<semaphore_mem>>) src(%28 : memref<1x512xf32, #tpu.memory_space<any>>) dst(%29 : memref<1x512xf32, #tpu.memory_space<any>>)
    %c1_i32_43 = arith.constant 1 : i32
    %c0_i32_44 = arith.constant 0 : i32
    %c0_i32_45 = arith.constant 0 : i32
    %c512_i32_46 = arith.constant 512 : i32
    %32 = tpu.memref_slice %arg0[%c0_i32_45, %c512_i32_46] : memref<2x1536xf32, #tpu.memory_space<any>> -> memref<1x512xf32, #tpu.memory_space<any>>
    %c0_i32_47 = arith.constant 0 : i32
    %c0_i32_48 = arith.constant 0 : i32
    %33 = tpu.memref_slice %arg2[%c0_i32_47, %c0_i32_48] : memref<2x512xf32, #tpu.memory_space<any>> -> memref<1x512xf32, #tpu.memory_space<any>>
    %34 = tpu.memref_slice %arg4[%c1_i32_43, %c0_i32_44] : memref<3x2x!tpu.dma_semaphore, #tpu.memory_space<semaphore_mem>> -> memref<1x1x!tpu.dma_semaphore, #tpu.memory_space<semaphore_mem>>
    %35 = tpu.memref_squeeze %34 : memref<1x1x!tpu.dma_semaphore, #tpu.memory_space<semaphore_mem>> -> memref<!tpu.dma_semaphore, #tpu.memory_space<semaphore_mem>>
    tpu.wait_dma2 semaphore(%35 : memref<!tpu.dma_semaphore, #tpu.memory_space<semaphore_mem>>) src(%32 : memref<1x512xf32, #tpu.memory_space<any>>) dst(%33 : memref<1x512xf32, #tpu.memory_space<any>>)
    %c1_i32_49 = arith.constant 1 : i32
    %c1_i32_50 = arith.constant 1 : i32
    %c1_i32_51 = arith.constant 1 : i32
    %c512_i32_52 = arith.constant 512 : i32
    %36 = tpu.memref_slice %arg0[%c1_i32_51, %c512_i32_52] : memref<2x1536xf32, #tpu.memory_space<any>> -> memref<1x512xf32, #tpu.memory_space<any>>
    %c1_i32_53 = arith.constant 1 : i32
    %c0_i32_54 = arith.constant 0 : i32
    %37 = tpu.memref_slice %arg2[%c1_i32_53, %c0_i32_54] : memref<2x512xf32, #tpu.memory_space<any>> -> memref<1x512xf32, #tpu.memory_space<any>>
    %38 = tpu.memref_slice %arg4[%c1_i32_49, %c1_i32_50] : memref<3x2x!tpu.dma_semaphore, #tpu.memory_space<semaphore_mem>> -> memref<1x1x!tpu.dma_semaphore, #tpu.memory_space<semaphore_mem>>
    %39 = tpu.memref_squeeze %38 : memref<1x1x!tpu.dma_semaphore, #tpu.memory_space<semaphore_mem>> -> memref<!tpu.dma_semaphore, #tpu.memory_space<semaphore_mem>>
    tpu.wait_dma2 semaphore(%39 : memref<!tpu.dma_semaphore, #tpu.memory_space<semaphore_mem>>) src(%36 : memref<1x512xf32, #tpu.memory_space<any>>) dst(%37 : memref<1x512xf32, #tpu.memory_space<any>>)
    %c2_i32_55 = arith.constant 2 : i32
    %c0_i32_56 = arith.constant 0 : i32
    %c0_i32_57 = arith.constant 0 : i32
    %c1024_i32_58 = arith.constant 1024 : i32
    %40 = tpu.memref_slice %arg0[%c0_i32_57, %c1024_i32_58] : memref<2x1536xf32, #tpu.memory_space<any>> -> memref<1x512xf32, #tpu.memory_space<any>>
    %c0_i32_59 = arith.constant 0 : i32
    %c0_i32_60 = arith.constant 0 : i32
    %41 = tpu.memref_slice %arg3[%c0_i32_59, %c0_i32_60] : memref<2x512xf32, #tpu.memory_space<any>> -> memref<1x512xf32, #tpu.memory_space<any>>
    %42 = tpu.memref_slice %arg4[%c2_i32_55, %c0_i32_56] : memref<3x2x!tpu.dma_semaphore, #tpu.memory_space<semaphore_mem>> -> memref<1x1x!tpu.dma_semaphore, #tpu.memory_space<semaphore_mem>>
    %43 = tpu.memref_squeeze %42 : memref<1x1x!tpu.dma_semaphore, #tpu.memory_space<semaphore_mem>> -> memref<!tpu.dma_semaphore, #tpu.memory_space<semaphore_mem>>
    tpu.wait_dma2 semaphore(%43 : memref<!tpu.dma_semaphore, #tpu.memory_space<semaphore_mem>>) src(%40 : memref<1x512xf32, #tpu.memory_space<any>>) dst(%41 : memref<1x512xf32, #tpu.memory_space<any>>)
    %c2_i32_61 = arith.constant 2 : i32
    %c1_i32_62 = arith.constant 1 : i32
    %c1_i32_63 = arith.constant 1 : i32
    %c1024_i32_64 = arith.constant 1024 : i32
    %44 = tpu.memref_slice %arg0[%c1_i32_63, %c1024_i32_64] : memref<2x1536xf32, #tpu.memory_space<any>> -> memref<1x512xf32, #tpu.memory_space<any>>
    %c1_i32_65 = arith.constant 1 : i32
    %c0_i32_66 = arith.constant 0 : i32
    %45 = tpu.memref_slice %arg3[%c1_i32_65, %c0_i32_66] : memref<2x512xf32, #tpu.memory_space<any>> -> memref<1x512xf32, #tpu.memory_space<any>>
    %46 = tpu.memref_slice %arg4[%c2_i32_61, %c1_i32_62] : memref<3x2x!tpu.dma_semaphore, #tpu.memory_space<semaphore_mem>> -> memref<1x1x!tpu.dma_semaphore, #tpu.memory_space<semaphore_mem>>
    %47 = tpu.memref_squeeze %46 : memref<1x1x!tpu.dma_semaphore, #tpu.memory_space<semaphore_mem>> -> memref<!tpu.dma_semaphore, #tpu.memory_space<semaphore_mem>>
    tpu.wait_dma2 semaphore(%47 : memref<!tpu.dma_semaphore, #tpu.memory_space<semaphore_mem>>) src(%44 : memref<1x512xf32, #tpu.memory_space<any>>) dst(%45 : memref<1x512xf32, #tpu.memory_space<any>>)
    return
  }
}

</mosaic_0001>

<bundles_post_ra>
// kernel: tpu_custom_call.1
= control target key start
LH: loop header
LB: loop body
LE: loop exit
PB: predicated region body
PF: predicated region fallthrough
CT: control target
= control target key end

     0   :  { %s182_s12 = smov 32   ;;  %s183_s13 = smov 1   ;;  %s278_s0 = inlined_call_operand.hbm [shape: f32[2,1536], index: 0, kind: input, shape index: {}]   ;;  %s279_s1 = inlined_call_operand.hbm [shape: f32[2,512], index: 1, kind: output, shape index: {0}]   ;;  %s280_s2 = inlined_call_operand.hbm [shape: f32[2,512], index: 2, kind: output, shape index: {1}]   ;;  %s281_s3 = inlined_call_operand.hbm [shape: f32[2,512], index: 3, kind: output, shape index: {2}]  }
   0x1   :  { %15 = sst [smem:[#allocation4]] %s182_s12  ;;  %s184_s14 = smov [#allocation2]  }
   0x2   :  { %17 = sst [smem:[#allocation4 + $0x1]] %s182_s12  ;;  %s185_s15 = smov 131072  }
   0x3   :  { %19 = sst [smem:[#allocation4 + $0x2]] %s183_s13  ;;  %s186_s16 = smov 0  }
   0x4   :  { %21 = dma.general %s278_s0, 64, %s279_s1, %s184_s14, %s185_s15, [#allocation4], %s186_s16, 0  }
   0x5   :  { %31 = sst [smem:[#allocation6]] %s182_s12  ;;  %s22_s23 = scalar_lea.hbm %s278_s0, 16 }
   0x6   :  { %33 = sst [smem:[#allocation6 + $0x1]] %s182_s12  ;;  %s23_s26 = scalar_lea.hbm %s279_s1, 16 }
   0x7   :  { %35 = sst [smem:[#allocation6 + $0x2]] %s183_s13  ;;  %s187_s27 = smov [#allocation2 + $0x1]  }
   0x8   :  { %37 = dma.general %s22_s23, 64, %s23_s26, %s187_s27, %s185_s15, [#allocation6], %s186_s16, 0  }
   0x9   :  { %46 = sst [smem:[#allocation8]] %s182_s12  ;;  %s38_s30 = scalar_lea.hbm %s278_s0, 128 }
   0xa   :  { %48 = sst [smem:[#allocation8 + $0x1]] %s182_s12  ;;  %s53_s1 = scalar_lea.hbm %s278_s0, 144 }
   0xb   :  { %50 = sst [smem:[#allocation8 + $0x2]] %s183_s13  ;;  %s188_s6 = smov [#allocation2 + $0x2]  }
   0xc   :  { %52 = dma.general %s38_s30, 64, %s280_s2, %s188_s6, %s185_s15, [#allocation8], %s186_s16, 0  }
   0xd   :  { %62 = sst [smem:[#allocation10]] %s182_s12  ;;  %s54_s11 = scalar_lea.hbm %s280_s2, 16 }
   0xe   :  { %64 = sst [smem:[#allocation10 + $0x1]] %s182_s12  ;;  %s69_s18 = scalar_lea.hbm %s278_s0, 256 }
   0xf   :  { %66 = sst [smem:[#allocation10 + $0x2]] %s183_s13  ;;  %s189_s19 = smov [#allocation2 + $0x3]  }
  0x10   :  { %68 = dma.general %s53_s1, 64, %s54_s11, %s189_s19, %s185_s15, [#allocation10], %s186_s16, 0  }
  0x11   :  { %77 = sst [smem:[#allocation12]] %s182_s12  ;;  %s84_s2 = scalar_lea.hbm %s278_s0, 272 }
  0x12   :  { %79 = sst [smem:[#allocation12 + $0x1]] %s182_s12  ;;  %s85_s24 = scalar_lea.hbm %s281_s3, 16 }
  0x13   :  { %81 = sst [smem:[#allocation12 + $0x2]] %s183_s13  ;;  %s190_s25 = smov [#allocation2 + $0x4]  }
  0x14   :  { %83 = dma.general %s69_s18, 64, %s281_s3, %s190_s25, %s185_s15, [#allocation12], %s186_s16, 0  }
  0x15   :  { %93 = sst [smem:[#allocation14]] %s182_s12  ;;  %s191_s0 = smov [#allocation2 + $0x5]  }
  0x16   :  { %95 = sst [smem:[#allocation14 + $0x1]] %s182_s12 }
  0x17   :  { %97 = sst [smem:[#allocation14 + $0x2]] %s183_s13 }
  0x18   :  { %99 = dma.general %s84_s2, 64, %s85_s24, %s191_s0, %s185_s15, [#allocation14], %s186_s16, 0  }
  0x19   :  { %170 = dma.done.wait [#allocation2], 64 }
  0x1a   :  { %171 = vsyncadd [#allocation2], 4294967232 }
  0x1b   :  { %172 = dma.done.wait [#allocation2 + $0x1], 64 }
  0x1c   :  { %173 = vsyncadd [#allocation2 + $0x1], 4294967232 }
  0x1d   :  { %174 = dma.done.wait [#allocation2 + $0x2], 64 }
  0x1e   :  { %175 = vsyncadd [#allocation2 + $0x2], 4294967232 }
  0x1f   :  { %176 = dma.done.wait [#allocation2 + $0x3], 64 }
  0x20   :  { %177 = vsyncadd [#allocation2 + $0x3], 4294967232 }
  0x21   :  { %178 = dma.done.wait [#allocation2 + $0x4], 64 }
  0x22   :  { %179 = vsyncadd [#allocation2 + $0x4], 4294967232 }
  0x23   :  { %180 = dma.done.wait [#allocation2 + $0x5], 64 }
  0x24   :  { %181 = vsyncadd [#allocation2 + $0x5], 4294967232 }
  0x25   :  { %113 = vsyncmov [#allocation2] }
  0x28   :  { %s114_s3 = vpop.sfrf %113 }
  0x29   :  { %p154_p0 = scmp.ne.s32.totalorder %s114_s3, 0 }
  0x2b   :  { %118 = shalt.err (%p154_p0)  }
  0x2c   :  { %120 = vsyncmov [#allocation2 + $0x1] }
  0x2f   :  { %s121_s12 = vpop.sfrf %120 }
  0x30   :  { %p155_p1 = scmp.ne.s32.totalorder %s121_s12, 0 }
  0x32   :  { %125 = shalt.err (%p155_p1)  }
  0x33   :  { %127 = vsyncmov [#allocation2 + $0x2] }
  0x36   :  { %s128_s13 = vpop.sfrf %127 }
  0x37   :  { %p156_p2 = scmp.ne.s32.totalorder %s128_s13, 0 }
  0x39   :  { %132 = shalt.err (%p156_p2)  }
  0x3a   :  { %134 = vsyncmov [#allocation2 + $0x3] }
  0x3d   :  { %s135_s15 = vpop.sfrf %134 }
  0x3e   :  { %p157_p3 = scmp.ne.s32.totalorder %s135_s15, 0 }
  0x40   :  { %139 = shalt.err (%p157_p3)  }
  0x41   :  { %141 = vsyncmov [#allocation2 + $0x4] }
  0x44   :  { %s142_s16 = vpop.sfrf %141 }
  0x45   :  { %p158_p4 = scmp.ne.s32.totalorder %s142_s16, 0 }
  0x47   :  { %146 = shalt.err (%p158_p4)  }
  0x48   :  { %148 = vsyncmov [#allocation2 + $0x5] }
  0x4b   :  { %s149_s28 = vpop.sfrf %148 }
  0x4c   :  { %p159_p5 = scmp.ne.s32.totalorder %s149_s28, 0 }
  0x4e   :  { %153 = shalt.err (%p159_p5)  }

</bundles_post_ra>
